<compile_context>
chip_gen: v7x
topology: tpu7x:2x2x1
jax: 0.10.0
libtpu: 0.0.40
codegen_flags: <defaults>
</compile_context>

<pallas_src>
import jax
import jax.numpy as jnp
from jax.experimental import pallas as pl
from jax.experimental.pallas import tpu as pltpu


def _generator_kernel(x_ref, w1_ref, b1_ref, w2_ref, b2_ref, o_ref,
                      acc_ref, h_ref):
    # x_ref : (tm, d_model)      resident across (j, k)
    # w1_ref: (d_model, tk)      only meaningful during the j == 0 pass
    # b1_ref: (1, tk)
    # w2_ref: (tk, tn)
    # b2_ref: (1, tn)
    # o_ref : (tm, tn)
    # acc_ref: (tm, tn) f32 scratch
    # h_ref : (n_k, tm, tk) scratch caching h = x @ W1 + b1 for this row tile
    j = pl.program_id(1)
    k = pl.program_id(2)

    # First projection: compute this d_ff tile of h only on the first vocab
    # pass (i is the outermost grid axis, so the cache is valid for all j).
    @pl.when(j == 0)
    def _():
        h = jnp.dot(x_ref[...], w1_ref[...],
                    preferred_element_type=jnp.float32)
        h = h + b1_ref[...].astype(jnp.float32)
        h_ref[k] = h.astype(h_ref.dtype)

    # Fold b2 into the accumulator init (removes the epilogue broadcast+add).
    @pl.when(k == 0)
    def _():
        acc_ref[...] = jnp.broadcast_to(
            b2_ref[...].astype(jnp.float32), acc_ref.shape)

    # Second projection: accumulate partial products over d_ff tiles.
    acc_ref[...] += jnp.dot(h_ref[k], w2_ref[...],
                            preferred_element_type=jnp.float32)

    @pl.when(k == pl.num_programs(2) - 1)
    def _():
        o_ref[...] = acc_ref[...].astype(o_ref.dtype)


def _round_up(x, m):
    return ((x + m - 1) // m) * m


def _vmem_capacity_bytes():
    """Physical per-core VMEM; conservative fallback if the query fails."""
    try:
        info = pltpu.get_tpu_info()
        cap = getattr(info, "vmem_capacity_bytes", None)
        if cap:
            return int(cap)
    except Exception:
        pass
    return 64 * 1024 * 1024  # v7x per-TensorCore VMEM (smallest generation)


def _estimate_vmem(tm, tn, tk, d_model, f_pad, itemsize):
    n_k = f_pad // tk
    return (2 * tm * d_model * itemsize        # x tile (double-buffered)
            + 2 * d_model * tk * itemsize      # W1 tile
            + 2 * tk * itemsize                # b1 tile
            + 2 * tk * tn * itemsize           # W2 tile
            + 2 * tn * itemsize                # b2 tile
            + 2 * tm * tn * itemsize           # out tile
            + tm * tn * 4                      # f32 accumulator
            + n_k * tm * tk * itemsize)        # cached h


def generator(x, w1, b1, w2, b2, *, tm=None, tn=None, tk=None,
              compute_dtype=None):
    """Fused Generator forward.

    x : (batch, seq, d_model)
    w1: (d_model, d_ff)     b1: (d_ff,)        (pre-transposed nn.Linear W^T)
    w2: (d_ff, vocab_num)   b2: (vocab_num,)
    compute_dtype: optionally cast x/W1/W2 (e.g. jnp.bfloat16) for the bf16
                   MXU fast path; default None preserves input precision so
                   results match the f32 PyTorch reference.
    returns (batch, seq, vocab_num)
    """
    batch, seq, d_model = x.shape
    d_ff = w1.shape[1]
    vocab = w2.shape[1]
    assert w1.shape == (d_model, d_ff)
    assert w2.shape == (d_ff, vocab)
    assert b1.shape == (d_ff,) and b2.shape == (vocab,)

    if compute_dtype is not None:
        x = x.astype(compute_dtype)
        w1 = w1.astype(compute_dtype)
        w2 = w2.astype(compute_dtype)

    out_dtype = x.dtype
    itemsize = jnp.dtype(x.dtype).itemsize
    M = batch * seq

    vmem_cap = _vmem_capacity_bytes()
    # Leave headroom for compiler scratch / semaphores; cap below physical.
    vmem_limit = int(max(32 * 1024 * 1024,
                         min(vmem_cap - 16 * 1024 * 1024,
                             100 * 1024 * 1024)))

    # bf16 packs 16 rows per vreg; keep row tiles 16-aligned for sub-32-bit.
    row_mult = 16 if itemsize < 4 else 8

    if tm is None:
        # 128 MiB VMEM chips (v5e/v6e): tm=512 toward the v6e roofline
        # crossover. 64 MiB (v7x): tm=384 already saturates the MXU in bf16.
        tm = 512 if vmem_cap >= (100 << 20) else 384
        tm = min(tm, _round_up(M, row_mult))
    if tn is None:
        tn = min(512, _round_up(vocab, 128))
    if tk is None:
        tk = min(512, _round_up(d_ff, 128))

    # Shrink tiles if the estimated working set would not fit the budget.
    f_pad = _round_up(d_ff, tk)
    budget = int(0.8 * vmem_limit)
    while (_estimate_vmem(tm, tn, tk, d_model, f_pad, itemsize) > budget
           and tm > 2 * row_mult):
        tm = _round_up(tm // 2, row_mult)
    while (_estimate_vmem(tm, tn, tk, d_model, f_pad, itemsize) > budget
           and tk > 128):
        tk = max(128, tk // 2)
        f_pad = _round_up(d_ff, tk)

    M_pad = _round_up(M, tm)
    V_pad = _round_up(vocab, tn)
    F_pad = f_pad
    n_i, n_j, n_k = M_pad // tm, V_pad // tn, F_pad // tk

    x2d = x.reshape(M, d_model)
    if M_pad != M:
        x2d = jnp.pad(x2d, ((0, M_pad - M), (0, 0)))
    if F_pad != d_ff:
        # Zero padding along d_ff contributes nothing to the second matmul.
        w1 = jnp.pad(w1, ((0, 0), (0, F_pad - d_ff)))
        b1 = jnp.pad(b1, (0, F_pad - d_ff))
        w2 = jnp.pad(w2, ((0, F_pad - d_ff), (0, 0)))
    if V_pad != vocab:
        w2 = jnp.pad(w2, ((0, 0), (0, V_pad - vocab)))
        b2 = jnp.pad(b2, (0, V_pad - vocab))

    b1_2d = b1.reshape(1, F_pad)
    b2_2d = b2.reshape(1, V_pad)

    # W1/b1 are only consumed during the j == 0 pass; pin their block index
    # afterwards so the pipeline does not re-stream them from HBM per vocab
    # tile (Pallas skips the DMA when the block index does not change).
    def w1_map(i, j, k):
        return (0, jnp.where(j == 0, k, n_k - 1))

    def b1_map(i, j, k):
        return (0, jnp.where(j == 0, k, n_k - 1))

    grid = (n_i, n_j, n_k)

    # Advisory cost estimate: count weight re-streaming (once per row tile).
    flops = 2 * M_pad * d_model * F_pad + 2 * M_pad * F_pad * V_pad
    bytes_accessed = itemsize * (
        M_pad * d_model                # x (resident across j, k)
        + n_i * d_model * F_pad        # W1 re-streamed per row tile
        + n_i * F_pad * V_pad          # W2 re-streamed per row tile
        + n_i * (F_pad + V_pad)        # biases
        + M_pad * V_pad)               # output
    cost = pl.CostEstimate(flops=int(flops), transcendentals=0,
                           bytes_accessed=int(bytes_accessed))

    out2d = pl.pallas_call(
        _generator_kernel,
        out_shape=jax.ShapeDtypeStruct((M_pad, V_pad), out_dtype),
        grid_spec=pltpu.PrefetchScalarGridSpec(
            num_scalar_prefetch=0,
            grid=grid,
            in_specs=[
                # x rows: invariant in (j, k) -> stays resident per row tile.
                pl.BlockSpec((tm, d_model), lambda i, j, k: (i, 0)),
                # W1 column tile and matching b1 tile (pinned for j > 0).
                pl.BlockSpec((d_model, tk), w1_map),
                pl.BlockSpec((1, tk), b1_map),
                # W2 (d_ff tile, vocab tile) and matching b2 tile.
                pl.BlockSpec((tk, tn), lambda i, j, k: (k, j)),
                pl.BlockSpec((1, tn), lambda i, j, k: (0, j)),
            ],
            out_specs=pl.BlockSpec((tm, tn), lambda i, j, k: (i, j)),
            scratch_shapes=[
                pltpu.VMEM((tm, tn), jnp.float32),      # f32 accumulator
                pltpu.VMEM((n_k, tm, tk), x.dtype),     # cached h tiles
            ],
        ),
        compiler_params=pltpu.CompilerParams(
            # Row axis is megacore-shardable; j/k must stay "arbitrary" so
            # every core executes the j == 0 pass that fills the h cache.
            dimension_semantics=("parallel", "arbitrary", "arbitrary"),
            vmem_limit_bytes=vmem_limit,
        ),
        cost_estimate=cost,
    )(x2d, w1, b1_2d, w2, b2_2d)

    return out2d[:M, :vocab].reshape(batch, seq, vocab)


def _ref_generator(x, w1, b1, w2, b2):
    h = jnp.dot(x, w1) + b1
    return jnp.dot(h, w2) + b2


def _make_case(key, batch, seq, d_model, vocab_num, dtype=jnp.float32):
    d_ff = 4 * d_model
    kx, k1, k2, k3, k4 = jax.random.split(key, 5)
    x = jax.random.normal(kx, (batch, seq, d_model), dtype=dtype)
    bound1 = 1.0 / (d_model ** 0.5)
    w1 = jax.random.uniform(k1, (d_model, d_ff), dtype, -bound1, bound1)
    b1 = jax.random.uniform(k2, (d_ff,), dtype, -bound1, bound1)
    bound2 = 1.0 / (d_ff ** 0.5)
    w2 = jax.random.uniform(k3, (d_ff, vocab_num), dtype, -bound2, bound2)
    b2 = jax.random.uniform(k4, (vocab_num,), dtype, -bound2, bound2)
    return x, w1, b1, w2, b2


if __name__ == "__main__":
    key = jax.random.PRNGKey(0)
    k_a, k_b = jax.random.split(key)

    # Case 1: small, tile-aligned shapes (Generator(d_model=32, vocab=128)).
    x, w1, b1, w2, b2 = _make_case(k_a, batch=2, seq=8, d_model=32,
                                   vocab_num=128)
    out = jax.block_until_ready(generator(x, w1, b1, w2, b2))
    ref = _ref_generator(x, w1, b1, w2, b2)
    assert out.shape == (2, 8, 128)
    assert jnp.allclose(out, ref, atol=1e-4, rtol=1e-4), "case1 mismatch"

    # Case 2: awkward shapes exercising M / d_ff / vocab padding paths.
    x, w1, b1, w2, b2 = _make_case(k_b, batch=3, seq=5, d_model=24,
                                   vocab_num=100)
    out = jax.block_until_ready(generator(x, w1, b1, w2, b2))
    ref = _ref_generator(x, w1, b1, w2, b2)
    assert out.shape == (3, 5, 100)
    assert jnp.allclose(out, ref, atol=1e-4, rtol=1e-4), "case2 mismatch"

    print("KERNEL_OK")
</pallas_src>

<mosaic_0001>
module attributes {stable_mosaic.version = 11 : i64} {
  func.func @_generator_kernel(%arg0: i32, %arg1: i32, %arg2: i32, %arg3: memref<16x32xf32, #tpu.memory_space<vmem>>, %arg4: memref<32x128xf32, #tpu.memory_space<vmem>>, %arg5: memref<1x128xf32, #tpu.memory_space<vmem>>, %arg6: memref<128x128xf32, #tpu.memory_space<vmem>>, %arg7: memref<1x128xf32, #tpu.memory_space<vmem>>, %arg8: memref<16x128xf32, #tpu.memory_space<vmem>>, %arg9: memref<16x128xf32, #tpu.memory_space<vmem>>, %arg10: memref<1x16x128xf32, #tpu.memory_space<vmem>>) attributes {dimension_semantics = [#tpu.dimension_semantics<parallel>, #tpu.dimension_semantics<arbitrary>, #tpu.dimension_semantics<arbitrary>], iteration_bounds = array<i64: 1, 1, 1>, scalar_prefetch = 0 : i64, scratch_operands = 2 : i64, tpu.core_type = #tpu.core_type<tc>, window_params = [{transform_indices = @transform_0, window_bounds = array<i64: 16, 32>}, {transform_indices = @transform_1, window_bounds = array<i64: 32, 128>}, {transform_indices = @transform_2, window_bounds = array<i64: 1, 128>}, {transform_indices = @transform_3, window_bounds = array<i64: 128, 128>}, {transform_indices = @transform_4, window_bounds = array<i64: 1, 128>}, {transform_indices = @transform_5, window_bounds = array<i64: 16, 128>}]} {
    %c0_i32 = arith.constant 0 : i32
    %0 = arith.cmpi eq, %arg1, %c0_i32 : i32
    %1 = arith.extui %0 : i1 to i32
    %c0_i32_0 = arith.constant 0 : i32
    %2 = arith.cmpi ne, %1, %c0_i32_0 : i32
    scf.if %2 {
      %c0_12 = arith.constant 0 : index
      %c0_13 = arith.constant 0 : index
      %17 = vector.load %arg3[%c0_12, %c0_13] : memref<16x32xf32, #tpu.memory_space<vmem>>, vector<16x32xf32>
      %c0_14 = arith.constant 0 : index
      %c0_15 = arith.constant 0 : index
      %18 = vector.load %arg4[%c0_14, %c0_15] : memref<32x128xf32, #tpu.memory_space<vmem>>, vector<32x128xf32>
      %cst_16 = arith.constant dense<0.000000e+00> : vector<16x128xf32>
      %19 = tpu.matmul %17, %18, %cst_16 {dimension_numbers = #tpu.dot_dimension_numbers<[1], [0], [0], [1], [0, 0, 1, 1], [], []>} : vector<16x32xf32>, vector<32x128xf32>, vector<16x128xf32> -> vector<16x128xf32>
      %c0_17 = arith.constant 0 : index
      %c0_18 = arith.constant 0 : index
      %20 = vector.load %arg5[%c0_17, %c0_18] : memref<1x128xf32, #tpu.memory_space<vmem>>, vector<1x128xf32>
      %21 = vector.broadcast %20 : vector<1x128xf32> to vector<16x128xf32>
      %22 = arith.addf %19, %21 : vector<16x128xf32>
      %23 = arith.index_cast %arg2 : i32 to index
      %c0_19 = arith.constant 0 : index
      %c0_20 = arith.constant 0 : index
      %24 = vector.load %arg10[%23, %c0_19, %c0_20] : memref<1x16x128xf32, #tpu.memory_space<vmem>>, vector<1x16x128xf32>
      %25 = vector.shape_cast %24 : vector<1x16x128xf32> to vector<16x128xf32>
      %26 = vector.shape_cast %22 : vector<16x128xf32> to vector<1x16x128xf32>
      tpu.vector_store %arg10[%23, %c0_19, %c0_20], %26 {strides = array<i32>} : memref<1x16x128xf32, #tpu.memory_space<vmem>>, vector<1x16x128xf32>,
    } else {
    }
    %c0_i32_1 = arith.constant 0 : i32
    %3 = arith.cmpi eq, %arg2, %c0_i32_1 : i32
    %4 = arith.extui %3 : i1 to i32
    %c0_i32_2 = arith.constant 0 : i32
    %5 = arith.cmpi ne, %4, %c0_i32_2 : i32
    scf.if %5 {
      %c0_12 = arith.constant 0 : index
      %c0_13 = arith.constant 0 : index
      %17 = vector.load %arg7[%c0_12, %c0_13] : memref<1x128xf32, #tpu.memory_space<vmem>>, vector<1x128xf32>
      %18 = vector.shape_cast %17 : vector<1x128xf32> to vector<1x128xf32>
      %19 = vector.broadcast %18 : vector<1x128xf32> to vector<16x128xf32>
      %c0_14 = arith.constant 0 : index
      %c0_15 = arith.constant 0 : index
      %20 = vector.load %arg9[%c0_14, %c0_15] : memref<16x128xf32, #tpu.memory_space<vmem>>, vector<16x128xf32>
      tpu.vector_store %arg9[%c0_14, %c0_15], %19 {strides = array<i32>} : memref<16x128xf32, #tpu.memory_space<vmem>>, vector<16x128xf32>,
    } else {
    }
    %c0 = arith.constant 0 : index
    %c0_3 = arith.constant 0 : index
    %6 = vector.load %arg9[%c0, %c0_3] : memref<16x128xf32, #tpu.memory_space<vmem>>, vector<16x128xf32>
    %7 = arith.index_cast %arg2 : i32 to index
    %c0_4 = arith.constant 0 : index
    %c0_5 = arith.constant 0 : index
    %8 = vector.load %arg10[%7, %c0_4, %c0_5] : memref<1x16x128xf32, #tpu.memory_space<vmem>>, vector<1x16x128xf32>
    %9 = vector.shape_cast %8 : vector<1x16x128xf32> to vector<16x128xf32>
    %c0_6 = arith.constant 0 : index
    %c0_7 = arith.constant 0 : index
    %10 = vector.load %arg6[%c0_6, %c0_7] : memref<128x128xf32, #tpu.memory_space<vmem>>, vector<128x128xf32>
    %cst = arith.constant dense<0.000000e+00> : vector<16x128xf32>
    %11 = tpu.matmul %9, %10, %cst {dimension_numbers = #tpu.dot_dimension_numbers<[1], [0], [0], [1], [0, 0, 1, 1], [], []>} : vector<16x128xf32>, vector<128x128xf32>, vector<16x128xf32> -> vector<16x128xf32>
    %12 = arith.addf %6, %11 : vector<16x128xf32>
    %c0_8 = arith.constant 0 : index
    %c0_9 = arith.constant 0 : index
    %13 = vector.load %arg9[%c0_8, %c0_9] : memref<16x128xf32, #tpu.memory_space<vmem>>, vector<16x128xf32>
    tpu.vector_store %arg9[%c0_8, %c0_9], %12 {strides = array<i32>} : memref<16x128xf32, #tpu.memory_space<vmem>>, vector<16x128xf32>,
    %c0_i32_10 = arith.constant 0 : i32
    %14 = arith.cmpi eq, %arg2, %c0_i32_10 : i32
    %15 = arith.extui %14 : i1 to i32
    %c0_i32_11 = arith.constant 0 : i32
    %16 = arith.cmpi ne, %15, %c0_i32_11 : i32
    scf.if %16 {
      %c0_12 = arith.constant 0 : index
      %c0_13 = arith.constant 0 : index
      %17 = vector.load %arg9[%c0_12, %c0_13] : memref<16x128xf32, #tpu.memory_space<vmem>>, vector<16x128xf32>
      %c0_14 = arith.constant 0 : index
      %c0_15 = arith.constant 0 : index
      %18 = vector.load %arg8[%c0_14, %c0_15] : memref<16x128xf32, #tpu.memory_space<vmem>>, vector<16x128xf32>
      tpu.vector_store %arg8[%c0_14, %c0_15], %17 {strides = array<i32>} : memref<16x128xf32, #tpu.memory_space<vmem>>, vector<16x128xf32>,
    } else {
    }
    return
  }
  func.func @transform_0(%arg0: i32, %arg1: i32, %arg2: i32) -> (i32, i32) {
    %c0_i32 = arith.constant 0 : i32
    %c0_i32_0 = arith.constant 0 : i32
    return %arg0, %c0_i32 : i32, i32
  }
  func.func @transform_1(%arg0: i32, %arg1: i32, %arg2: i32) -> (i32, i32) {
    %c0_i32 = arith.constant 0 : i32
    %0 = arith.cmpi eq, %arg1, %c0_i32 : i32
    %c0_i32_0 = arith.constant 0 : i32
    %1 = arith.select %0, %arg2, %c0_i32_0 : i32
    %c0_i32_1 = arith.constant 0 : i32
    %c0_i32_2 = arith.constant 0 : i32
    return %c0_i32_1, %1 : i32, i32
  }
  func.func @transform_2(%arg0: i32, %arg1: i32, %arg2: i32) -> (i32, i32) {
    %c0_i32 = arith.constant 0 : i32
    %0 = arith.cmpi eq, %arg1, %c0_i32 : i32
    %c0_i32_0 = arith.constant 0 : i32
    %1 = arith.select %0, %arg2, %c0_i32_0 : i32
    %c0_i32_1 = arith.constant 0 : i32
    %c0_i32_2 = arith.constant 0 : i32
    return %c0_i32_1, %1 : i32, i32
  }
  func.func @transform_3(%arg0: i32, %arg1: i32, %arg2: i32) -> (i32, i32) {
    %c0_i32 = arith.constant 0 : i32
    return %arg2, %arg1 : i32, i32
  }
  func.func @transform_4(%arg0: i32, %arg1: i32, %arg2: i32) -> (i32, i32) {
    %c0_i32 = arith.constant 0 : i32
    %c0_i32_0 = arith.constant 0 : i32
    return %c0_i32, %arg1 : i32, i32
  }
  func.func @transform_5(%arg0: i32, %arg1: i32, %arg2: i32) -> (i32, i32) {
    %c0_i32 = arith.constant 0 : i32
    return %arg0, %arg1 : i32, i32
  }
}

</mosaic_0001>

<bundles_post_ra>
// kernel: tpu_custom_call.1
= control target key start
LH: loop header
LB: loop body
LE: loop exit
PB: predicated region body
PF: predicated region fallthrough
CT: control target
= control target key end

     0   :  { %10 = vsyncpa [#allocation5], 0  ;;  %s659_s0 = inlined_call_operand.hbm [shape: f32[16,32], index: 0, kind: input, shape index: {}]   ;;  %s660_s1 = inlined_call_operand.hbm [shape: f32[32,128], index: 1, kind: input, shape index: {}]   ;;  %s661_s2 = inlined_call_operand.vmem [shape: f32[1,128], index: 2, kind: input, shape index: {}]   ;;  %s662_s3 = inlined_call_operand.hbm [shape: f32[128,128], index: 3, kind: input, shape index: {}]   ;;  %s663_s4 = inlined_call_operand.vmem [shape: f32[1,128], index: 4, kind: input, shape index: {}]   ;;  %s664_s5 = inlined_call_operand.hbm [shape: f32[16,128], index: 5, kind: output, shape index: {}]  }
   0x1   :  { %11 = vsyncpa [#allocation8], 0 }
   0x2   :  { %12 = vsyncpa [#allocation6], 0  ;;  %s548_s18 = smov [#allocation7]   ;;  %s549_s20 = smov [#allocation4]  }
   0x3   :  { %s34_s19 = sshll.u32 %s548_s18, 4  ;;  %s18_s21 = sshll.u32 %s549_s20, 4  ;;  %s35_s19 = int_to_ptr.vmem [resolvable:$true] %s34_s19  ;;  %s584_s21 = int_to_ptr.vmem [resolvable:$true] %s18_s21 }
   0x4   :  { %s454_s24 = scalar_lea.hbm %s660_s1, 512 }
   0x5   :  { %p455_p0 = scmp.ne.s32.totalorder %s660_s1, %s454_s24  ;;  %p458_p1 = scmp.lt.u32.totalorder %s454_s24, %s660_s1 }
   0x7   :  { %p460_p2 = pnand %p458_p1, %p455_p0 }
   0x9   :  { %463 = shalt.err (!%p460_p2)
}
   0xa   :  { %s464_s29 = scalar_lea.vmem %s35_s19, 512  ;;  %p469_p4 = scmp.lt.s32.totalorder %s35_s19, %s35_s19 }
   0xb   :  { %p465_p3 = scmp.ne.s32.totalorder %s35_s19, %s464_s29  ;;  %p470_p5 = scmp.lt.s32.totalorder %s464_s29, %s464_s29 }
   0xd   :  { %p471_p6 = por %p470_p5, %p469_p4 }
   0xf   :  { %p472_p7 = pnand %p471_p6, %p465_p3 }
  0x11   :  { %475 = shalt.err (!%p472_p7)
}
  0x12   :  { %s550_s30 = smov 128   ;;  %s551_s6 = smov 8  }
  0x13   :  { %40 = dma.hbm_to_vmem [thread:$0]  %s660_s1, 512, %s35_s19, [#allocation8], %s550_s30, %s550_s30, %s551_s6  }
  0x14   :  { %s476_s11 = scalar_lea.hbm %s659_s0, 256 }
  0x15   :  { %p477_p8 = scmp.ne.s32.totalorder %s659_s0, %s476_s11  ;;  %p480_p9 = scmp.lt.u32.totalorder %s476_s11, %s659_s0 }
  0x17   :  { %p482_p10 = pnand %p480_p9, %p477_p8 }
  0x19   :  { %485 = shalt.err (!%p482_p10)
}
  0x1a   :  { %s486_s16 = scalar_lea.vmem %s584_s21, 256  ;;  %p491_p12 = scmp.lt.s32.totalorder %s584_s21, %s584_s21 }
  0x1b   :  { %p487_p11 = scmp.ne.s32.totalorder %s584_s21, %s486_s16  ;;  %p492_p13 = scmp.lt.s32.totalorder %s486_s16, %s486_s16 }
  0x1d   :  { %p493_p0 = por %p492_p13, %p491_p12 }
  0x1f   :  { %p494_p1 = pnand %p493_p0, %p487_p11 }
  0x21   :  { %497 = shalt.err (!%p494_p1)
}
  0x22   :  { %24 = dma.hbm_to_vmem [thread:$0]  %s659_s0, 256, %s584_s21, [#allocation5], %s550_s30, %s550_s30, %s551_s6  }
  0x23   :  { %s552_s18 = smov [#allocation9]   ;;  %s498_s23 = scalar_lea.hbm %s662_s3, 2048 }
  0x24   :  { %s55_s19 = sshll.u32 %s552_s18, 4  ;;  %p499_p2 = scmp.ne.s32.totalorder %s662_s3, %s498_s23  ;;  %s56_s19 = int_to_ptr.vmem [resolvable:$true] %s55_s19 }
  0x25   :  { %p502_p3 = scmp.lt.u32.totalorder %s498_s23, %s662_s3 }
  0x27   :  { %p504_p4 = pnand %p502_p3, %p499_p2 }
  0x29   :  { %507 = shalt.err (!%p504_p4)
}
  0x2a   :  { %s508_s28 = scalar_lea.vmem %s56_s19, 2048  ;;  %p513_p6 = scmp.lt.s32.totalorder %s56_s19, %s56_s19 }
  0x2b   :  { %p509_p5 = scmp.ne.s32.totalorder %s56_s19, %s508_s28  ;;  %p514_p7 = scmp.lt.s32.totalorder %s508_s28, %s508_s28 }
  0x2d   :  { %p515_p8 = por %p514_p7, %p513_p6 }
  0x2f   :  { %p516_p9 = pnand %p515_p8, %p509_p5 }
  0x31   :  { %519 = shalt.err (!%p516_p9)
}
  0x32   :  { %61 = dma.hbm_to_vmem [thread:$0]  %s662_s3, 2048, %s56_s19, [#allocation8], %s550_s30, %s550_s30, %s551_s6  }
  0x33   :  { %542 = dma.done.wait [#allocation5], 256  }
  0x34   :  { %543 = vsyncadd [#allocation5], 4294967040 }
  0x35   :  { %544 = dma.done.wait [#allocation8], 2560  }
  0x36   :  { %545 = vsyncadd [#allocation8], 4294964736  ;;  %vm104_vm0 = vcmask 261120   ;;  %v93_v0 = vld [vmem:[#allocation7] sm:$0xff]  ;;  %v94_v1 = vld [vmem:[#allocation7 + $0x8] sm:$0xff]  ;;  %s553_s9 = smov [#allocation10]  }
  0x37   :  { %v95_v2 = vld [vmem:[#allocation7 + $0x10] sm:$0xff]  ;;  %v408_v3 = vpack.c.bf16 %v94_v1, %v93_v0  ;;  %v96_v4 = vld [vmem:[#allocation7 + $0x18] sm:$0xff]  ;;  %v209_v7 = vld [vmem:[#allocation9] sm:$0xff]  ;;  %s316_s10 = sshll.u32 %s553_s9, 4  ;;  %s317_s10 = int_to_ptr.vmem [resolvable:$true] %s316_s10 }
  0x38   :  { %v91_v5 = vld [vmem:[#allocation4] sm:$0xff]  ;;  %v412_v6 = vpack.c.bf16 %v96_v4, %v95_v2  ;;  %v210_v8 = vld [vmem:[#allocation9 + $0x8] sm:$0xff]  ;;  %v212_v11 = vld [vmem:[#allocation9 + $0x18] sm:$0xff]  ;;  %p525_p11 = scmp.lt.s32.totalorder %s317_s10, %s317_s10 }
  0x39   :  { %370 = vmatprep.mubr.msk.f32.mxu0 %vm104_vm0, %v91_v5  ;;  %v211_v9 = vld [vmem:[#allocation9 + $0x10] sm:$0xff]  ;;  %409 = vmatprep.subr.bf16.mxu0 %v408_v3  ;;  %v416_v10 = vpack.c.bf16 %v210_v8, %v209_v7  ;;  %v213_v13 = vld [vmem:[#allocation9 + $0x20] sm:$0xff]  ;;  %v214_v14 = vld [vmem:[#allocation9 + $0x28] sm:$0xff] }
  0x3a   :  { %411 = vmatpush3.bf16.msra.mxu0 %v408_v3  ;;  %v420_v12 = vpack.c.bf16 %v212_v11, %v211_v9  ;;  %v424_v15 = vpack.c.bf16 %v214_v14, %v213_v13  ;;  %v92_v16 = vld [vmem:[#allocation4 + $0x8] sm:$0xff]  ;;  %v215_v17 = vld [vmem:[#allocation9 + $0x30] sm:$0xff]  ;;  %v217_v20 = vld [vmem:[#allocation9 + $0x40] sm:$0xff] }
  0x3b   :  { %413 = vmatprep.subr.bf16.mxu0 %v412_v6  ;;  %417 = vmatprep.subr.bf16.mxu1 %v416_v10  ;;  %v216_v18 = vld [vmem:[#allocation9 + $0x38] sm:$0xff]  ;;  %v218_v21 = vld [vmem:[#allocation9 + $0x48] sm:$0xff]  ;;  %v219_v23 = vld [vmem:[#allocation9 + $0x50] sm:$0xff] }
  0x3c   :  { %419 = vmatpush3.bf16.msra.mxu1 %v416_v10  ;;  %v428_v19 = vpack.c.bf16 %v216_v18, %v215_v17  ;;  %v432_v22 = vpack.c.bf16 %v218_v21, %v217_v20  ;;  %v220_v24 = vld [vmem:[#allocation9 + $0x58] sm:$0xff]  ;;  %v221_v26 = vld [vmem:[#allocation9 + $0x60] sm:$0xff]  ;;  %v222_v27 = vld [vmem:[#allocation9 + $0x68] sm:$0xff] }
  0x3d   :  { %421 = vmatprep.subr.bf16.mxu1 %v420_v12  ;;  %v436_v25 = vpack.c.bf16 %v220_v24, %v219_v23  ;;  %v440_v28 = vpack.c.bf16 %v222_v27, %v221_v26  ;;  %v223_v29 = vld [vmem:[#allocation9 + $0x70] sm:$0xff]  ;;  %v224_v30 = vld [vmem:[#allocation9 + $0x78] sm:$0xff] }
  0x3e   :  { %415 = vmatpush3.bf16.msra.mxu0 %v412_v6  ;;  %v444_v31 = vpack.c.bf16 %v224_v30, %v223_v29  ;;  %v334_v32 = vld [vmem:[%s661_s2] ss:$0 sm:$0xff]  ;;  %s520_s2 = scalar_lea.vmem %s317_s10, 256 }
  0x3f   :  { %v337_v37 = vld [vmem:[%s663_s4] ss:$0 sm:$0xff]  ;;  %p521_p10 = scmp.ne.s32.totalorder %s317_s10, %s520_s2  ;;  %p526_p12 = scmp.lt.s32.totalorder %s520_s2, %s520_s2 }
  0x40   :  { %423 = vmatpush3.bf16.msra.mxu1 %v420_v12 }
  0x41   :  { %371 = vmatmul.mubr.msk.f32.vlgmr.msra.gmra.mrb[0].mxu0 %vm104_vm0, %v92_v16  ;;  %425 = vmatprep.subr.bf16.mxu1 %v424_v15  ;;  %p527_p13 = por %p526_p12, %p525_p11 }
  0x43   :  { %p528_p0 = pnand %p527_p13, %p521_p10 }
  0x44   :  { %427 = vmatpush3.bf16.msra.mxu1 %v424_v15 }
  0x45   :  { %429 = vmatprep.subr.bf16.mxu1 %v428_v19 }
  0x48   :  { %431 = vmatpush3.bf16.msra.mxu1 %v428_v19 }
  0x49   :  { %433 = vmatprep.subr.bf16.mxu1 %v432_v22 }
  0x4c   :  { %435 = vmatpush3.bf16.msra.mxu1 %v432_v22 }
  0x4d   :  { %437 = vmatprep.subr.bf16.mxu1 %v436_v25 }
  0x50   :  { %439 = vmatpush3.bf16.msra.mxu1 %v436_v25 }
  0x51   :  { %441 = vmatprep.subr.bf16.mxu1 %v440_v28 }
  0x54   :  { %443 = vmatpush3.bf16.msra.mxu1 %v440_v28 }
  0x55   :  { %445 = vmatprep.subr.bf16.mxu1 %v444_v31 }
  0x58   :  { %447 = vmatpush3.bf16.msra.mxu1 %v444_v31 }
 0x114   :  { %v372_v33 = vpop.f32.mrb[0].mxu0 }
 0x115   :  { %v177_v34 = vpop.f32.mrb[1].mxu0  ;;  %v183_v36 = vadd.f32 %v372_v33, %v334_v32 }
 0x116   :  { %v178_v35 = vadd.f32 %v334_v32, %v177_v34 }
 0x118   :  { %405 = vmatprep.mubr.f32.mxu1 %v178_v35 }
 0x119   :  { %406 = vmatmul.mubr.f32.vlgmr.msra.gmra.mrb[0].mxu1 %v183_v36 }
 0x1ec   :  { %v407_v38 = vpop.f32.mrb[0].mxu1 }
 0x1ed   :  { %v301_v39 = vadd.f32 %v407_v38, %v337_v37  ;;  %v291_v40 = vpop.f32.mrb[1].mxu1 }
 0x1ee   :  { %v300_v41 = vadd.f32 %v337_v37, %v291_v40 }
 0x1ef   :  { %310 = vst [vmem:[#allocation10 + $0x8] sm:$0xff] %v301_v39 }
 0x1f0   :  { %309 = vst [vmem:[#allocation10] sm:$0xff] %v300_v41 }
 0x1f1   :  { %531 = shalt.err (!%p528_p0)
}
 0x1f2   :  { %s532_s4 = scalar_lea.hbm %s664_s5, 256 }
 0x1f3   :  { %p533_p1 = scmp.ne.s32.totalorder %s664_s5, %s532_s4  ;;  %p536_p2 = scmp.lt.u32.totalorder %s532_s4, %s664_s5 }
 0x1f5   :  { %p538_p3 = pnand %p536_p2, %p533_p1 }
 0x1f7   :  { %541 = shalt.err (!%p538_p3)
}
 0x1f8   :  { %322 = dma.vmem_to_hbm [thread:$0]  %s317_s10, 256, %s664_s5, [#allocation6], %s550_s30, %s550_s30, %s551_s6  }
 0x1f9   :  { %546 = dma.done.wait [#allocation6], 256  }
 0x1fa   :  { %547 = vsyncadd [#allocation6], 4294967040 }
 0x1fb   :  { %326 = vsyncpa [#allocation5], 1 }
 0x1fc   :  { %327 = vsyncpa [#allocation8], 1 }
 0x1fd   :  { %328 = vsyncpa [#allocation6], 1 }

</bundles_post_ra>
